<compile_context>
chip_gen: v7x
topology: tpu7x:2x2x1
jax: 0.10.0
libtpu: 0.0.40
codegen_flags: <defaults>
</compile_context>

<pallas_src>
import functools

import jax
import jax.numpy as jnp
from jax.experimental import pallas as pl
from jax.experimental.pallas import tpu as pltpu


def _round_up(x, m):
    return ((x + m - 1) // m) * m


def _cdiv(a, b):
    return -(-a // b)


def _mlp_g_kernel(noise_ref, att_ref, w1n_ref, w1a_ref, b1_ref, w2_ref, b2_ref,
                  out_ref, *, slope):
    """One batch tile of the fused MLP_G forward.

    fc1 is fused with the concat:  cat([noise, att]) @ W1 == noise@W1[:nz] + att@W1[nz:].
    All matmuls accumulate in f32 on the MXU; elementwise ops run in f32 on the VPU.
    """
    h = (jnp.dot(noise_ref[...], w1n_ref[...], preferred_element_type=jnp.float32)
         + jnp.dot(att_ref[...], w1a_ref[...], preferred_element_type=jnp.float32)
         + b1_ref[...])
    h = jnp.maximum(h, slope * h)          # LeakyReLU(0.2): same result, 1 vmul + 1 vmax
    h = h.astype(w2_ref.dtype)             # feed the 2nd matmul at weight precision (bf16 on v6e/v7x)
    o = jnp.dot(h, w2_ref[...], preferred_element_type=jnp.float32) + b2_ref[...]
    o = jnp.maximum(o, 0.0)                # ReLU
    out_ref[...] = o.astype(out_ref.dtype)


def mlp_g_forward(noise, att, params, *, slope=0.2, tb=None,
                  compute_dtype=jnp.float32, out_dtype=None):
    """MLP_G forward.

    noise: [B, nz], att: [B, attSize]  (any float dtype)
    params: ((w1 [nz+attSize, ngh], b1 [ngh]), (w2 [ngh, resSize], b2 [resSize]))
            -- weights stored transposed w.r.t. PyTorch's [out, in].
    compute_dtype: dtype fed to the MXU (jnp.bfloat16 recommended on v6e/v7x);
                   accumulation is always f32.
    """
    (w1, b1), (w2, b2) = params
    B, nz = noise.shape
    _, att_size = att.shape
    d_in, ngh = w1.shape
    assert d_in == nz + att_size, "w1 input dim must equal nz + attSize"
    res_size = w2.shape[1]
    if out_dtype is None:
        out_dtype = noise.dtype

    # ---- adaptive batch tile (perf: amortize ~0.35us/step, keep v7x's 2 TCs busy) ----
    if tb is None:
        n_steps = max(1, _cdiv(B, 512))        # aim for <=512-row tiles
        if B > 256:
            n_steps = max(n_steps, 2)          # >=2 parallel grid steps when batch allows
        tb = _round_up(_cdiv(B, n_steps), 8)
    tb = max(8, min(tb, _round_up(B, 8)))
    B_pad = _round_up(B, tb)
    if B_pad != B:                              # pad instead of asserting divisibility
        noise = jnp.pad(noise, ((0, B_pad - B), (0, 0)))
        att = jnp.pad(att, ((0, B_pad - B), (0, 0)))

    # ---- cast MXU operands; biases stay f32 (added to the f32 accumulator) ----
    noise_c = noise.astype(compute_dtype)
    att_c = att.astype(compute_dtype)
    w1n = w1[:nz].astype(compute_dtype)         # noise part of fc1 (concat fused away)
    w1a = w1[nz:].astype(compute_dtype)         # att part of fc1
    w2c = w2.astype(compute_dtype)
    b1r = b1.reshape(1, ngh).astype(jnp.float32)
    b2r = b2.reshape(1, res_size).astype(jnp.float32)

    # Grid-invariant weight/bias blocks (same block every step).  Small here; for very
    # wide layers single-buffer them (pl.Buffered(1)) or stage once into VMEM scratch.
    def _const_spec(shape):
        return pl.BlockSpec(shape, lambda i: (0, 0))

    kernel = functools.partial(_mlp_g_kernel, slope=slope)

    out = pl.pallas_call(
        kernel,
        out_shape=jax.ShapeDtypeStruct((B_pad, res_size), out_dtype),
        grid_spec=pltpu.PrefetchScalarGridSpec(
            num_scalar_prefetch=0,
            grid=(B_pad // tb,),
            in_specs=[
                pl.BlockSpec((tb, nz), lambda i: (i, 0)),
                pl.BlockSpec((tb, att_size), lambda i: (i, 0)),
                _const_spec((nz, ngh)),
                _const_spec((att_size, ngh)),
                _const_spec((1, ngh)),
                _const_spec((ngh, res_size)),
                _const_spec((1, res_size)),
            ],
            out_specs=pl.BlockSpec((tb, res_size), lambda i: (i, 0)),
        ),
        compiler_params=pltpu.CompilerParams(
            dimension_semantics=("parallel",),   # batch axis: megacore / v7x TC sharding
        ),
    )(noise_c, att_c, w1n, w1a, b1r, w2c, b2r)

    return out[:B]


def init_mlp_g_params(key, att_size, nz, ngh, res_size):
    """weights_init: W ~ N(0, 0.02), b = 0.  Weights stored [in, out]; i.i.d. normal,
    so the transposed storage is distributionally equivalent to PyTorch's [out, in]."""
    k1, k2 = jax.random.split(key)
    w1 = 0.02 * jax.random.normal(k1, (nz + att_size, ngh), dtype=jnp.float32)
    b1 = jnp.zeros((ngh,), dtype=jnp.float32)
    w2 = 0.02 * jax.random.normal(k2, (ngh, res_size), dtype=jnp.float32)
    b2 = jnp.zeros((res_size,), dtype=jnp.float32)
    return ((w1, b1), (w2, b2))


def mlp_g_reference(noise, att, params, slope=0.2):
    """Pure-JAX reference matching the PyTorch forward."""
    (w1, b1), (w2, b2) = params
    h = jnp.concatenate([noise, att], axis=1)
    h = h @ w1 + b1
    h = jnp.where(h > 0, h, slope * h)     # LeakyReLU(0.2)
    h = h @ w2 + b2
    return jnp.maximum(h, 0.0)             # ReLU


if __name__ == "__main__":
    key = jax.random.PRNGKey(0)

    # Small but lane-friendly sizes consistent with MLP_G (attSize+nz -> ngh -> resSize).
    att_size, nz, ngh, res_size = 16, 16, 128, 128
    B = 12  # deliberately not a multiple of 8: exercises the wrapper's batch padding

    k_param, k_noise, k_att = jax.random.split(key, 3)
    params = init_mlp_g_params(k_param, att_size, nz, ngh, res_size)
    noise = jax.random.normal(k_noise, (B, nz), dtype=jnp.float32)
    att = jax.random.normal(k_att, (B, att_size), dtype=jnp.float32)

    ref = mlp_g_reference(noise, att, params)

    # f32 path (default).
    out = jax.block_until_ready(mlp_g_forward(noise, att, params))
    assert out.shape == (B, res_size)
    assert jnp.allclose(out, ref, atol=1e-4, rtol=1e-4), "f32 kernel mismatch vs reference"

    # bf16 weights/activations (v6e/v7x-native MXU path), f32 accumulation -> looser tol.
    out_bf16 = jax.block_until_ready(
        mlp_g_forward(noise, att, params, compute_dtype=jnp.bfloat16))
    assert jnp.allclose(out_bf16, ref, atol=2e-2, rtol=5e-2), "bf16 kernel mismatch vs reference"

    print("KERNEL_OK")
</pallas_src>

<mosaic_0001>
module attributes {stable_mosaic.version = 11 : i64} {
  func.func @_mlp_g_kernel(%arg0: i32, %arg1: memref<16x16xf32, #tpu.memory_space<vmem>>, %arg2: memref<16x16xf32, #tpu.memory_space<vmem>>, %arg3: memref<16x128xf32, #tpu.memory_space<vmem>>, %arg4: memref<16x128xf32, #tpu.memory_space<vmem>>, %arg5: memref<1x128xf32, #tpu.memory_space<vmem>>, %arg6: memref<128x128xf32, #tpu.memory_space<vmem>>, %arg7: memref<1x128xf32, #tpu.memory_space<vmem>>, %arg8: memref<16x128xf32, #tpu.memory_space<vmem>>) attributes {dimension_semantics = [#tpu.dimension_semantics<parallel>], iteration_bounds = array<i64: 1>, scalar_prefetch = 0 : i64, scratch_operands = 0 : i64, tpu.core_type = #tpu.core_type<tc>, window_params = [{transform_indices = @transform_0, window_bounds = array<i64: 16, 16>}, {transform_indices = @transform_1, window_bounds = array<i64: 16, 16>}, {pipeline_mode = #tpu.pipeline_mode<synchronous>, transform_indices = @transform_2, window_bounds = array<i64: 16, 128>}, {pipeline_mode = #tpu.pipeline_mode<synchronous>, transform_indices = @transform_3, window_bounds = array<i64: 16, 128>}, {pipeline_mode = #tpu.pipeline_mode<synchronous>, transform_indices = @transform_4, window_bounds = array<i64: 1, 128>}, {pipeline_mode = #tpu.pipeline_mode<synchronous>, transform_indices = @transform_5, window_bounds = array<i64: 128, 128>}, {pipeline_mode = #tpu.pipeline_mode<synchronous>, transform_indices = @transform_6, window_bounds = array<i64: 1, 128>}, {transform_indices = @transform_7, window_bounds = array<i64: 16, 128>}]} {
    %c0 = arith.constant 0 : index
    %c0_0 = arith.constant 0 : index
    %0 = vector.load %arg1[%c0, %c0_0] : memref<16x16xf32, #tpu.memory_space<vmem>>, vector<16x16xf32>
    %c0_1 = arith.constant 0 : index
    %c0_2 = arith.constant 0 : index
    %1 = vector.load %arg3[%c0_1, %c0_2] : memref<16x128xf32, #tpu.memory_space<vmem>>, vector<16x128xf32>
    %cst = arith.constant dense<0.000000e+00> : vector<16x128xf32>
    %2 = tpu.matmul %0, %1, %cst {dimension_numbers = #tpu.dot_dimension_numbers<[1], [0], [0], [1], [0, 0, 1, 1], [], []>} : vector<16x16xf32>, vector<16x128xf32>, vector<16x128xf32> -> vector<16x128xf32>
    %c0_3 = arith.constant 0 : index
    %c0_4 = arith.constant 0 : index
    %3 = vector.load %arg2[%c0_3, %c0_4] : memref<16x16xf32, #tpu.memory_space<vmem>>, vector<16x16xf32>
    %c0_5 = arith.constant 0 : index
    %c0_6 = arith.constant 0 : index
    %4 = vector.load %arg4[%c0_5, %c0_6] : memref<16x128xf32, #tpu.memory_space<vmem>>, vector<16x128xf32>
    %cst_7 = arith.constant dense<0.000000e+00> : vector<16x128xf32>
    %5 = tpu.matmul %3, %4, %cst_7 {dimension_numbers = #tpu.dot_dimension_numbers<[1], [0], [0], [1], [0, 0, 1, 1], [], []>} : vector<16x16xf32>, vector<16x128xf32>, vector<16x128xf32> -> vector<16x128xf32>
    %6 = arith.addf %2, %5 : vector<16x128xf32>
    %c0_8 = arith.constant 0 : index
    %c0_9 = arith.constant 0 : index
    %7 = vector.load %arg5[%c0_8, %c0_9] : memref<1x128xf32, #tpu.memory_space<vmem>>, vector<1x128xf32>
    %8 = vector.broadcast %7 : vector<1x128xf32> to vector<16x128xf32>
    %9 = arith.addf %6, %8 : vector<16x128xf32>
    %cst_10 = arith.constant 2.000000e-01 : f32
    %10 = vector.broadcast %cst_10 : f32 to vector<16x128xf32>
    %11 = arith.mulf %10, %9 : vector<16x128xf32>
    %12 = arith.maximumf %9, %11 : vector<16x128xf32>
    %c0_11 = arith.constant 0 : index
    %c0_12 = arith.constant 0 : index
    %13 = vector.load %arg6[%c0_11, %c0_12] : memref<128x128xf32, #tpu.memory_space<vmem>>, vector<128x128xf32>
    %cst_13 = arith.constant dense<0.000000e+00> : vector<16x128xf32>
    %14 = tpu.matmul %12, %13, %cst_13 {dimension_numbers = #tpu.dot_dimension_numbers<[1], [0], [0], [1], [0, 0, 1, 1], [], []>} : vector<16x128xf32>, vector<128x128xf32>, vector<16x128xf32> -> vector<16x128xf32>
    %c0_14 = arith.constant 0 : index
    %c0_15 = arith.constant 0 : index
    %15 = vector.load %arg7[%c0_14, %c0_15] : memref<1x128xf32, #tpu.memory_space<vmem>>, vector<1x128xf32>
    %16 = vector.broadcast %15 : vector<1x128xf32> to vector<16x128xf32>
    %17 = arith.addf %14, %16 : vector<16x128xf32>
    %cst_16 = arith.constant 0.000000e+00 : f32
    %18 = vector.broadcast %cst_16 : f32 to vector<16x128xf32>
    %19 = arith.maximumf %17, %18 : vector<16x128xf32>
    %c0_17 = arith.constant 0 : index
    %c0_18 = arith.constant 0 : index
    %20 = vector.load %arg8[%c0_17, %c0_18] : memref<16x128xf32, #tpu.memory_space<vmem>>, vector<16x128xf32>
    tpu.vector_store %arg8[%c0_17, %c0_18], %19 {strides = array<i32>} : memref<16x128xf32, #tpu.memory_space<vmem>>, vector<16x128xf32>,
    return
  }
  func.func @transform_0(%arg0: i32) -> (i32, i32) {
    %c0_i32 = arith.constant 0 : i32
    %c0_i32_0 = arith.constant 0 : i32
    return %arg0, %c0_i32 : i32, i32
  }
  func.func @transform_1(%arg0: i32) -> (i32, i32) {
    %c0_i32 = arith.constant 0 : i32
    %c0_i32_0 = arith.constant 0 : i32
    return %arg0, %c0_i32 : i32, i32
  }
  func.func @transform_2(%arg0: i32) -> (i32, i32) {
    %c0_i32 = arith.constant 0 : i32
    %c0_i32_0 = arith.constant 0 : i32
    %c0_i32_1 = arith.constant 0 : i32
    return %c0_i32, %c0_i32_0 : i32, i32
  }
  func.func @transform_3(%arg0: i32) -> (i32, i32) {
    %c0_i32 = arith.constant 0 : i32
    %c0_i32_0 = arith.constant 0 : i32
    %c0_i32_1 = arith.constant 0 : i32
    return %c0_i32, %c0_i32_0 : i32, i32
  }
  func.func @transform_4(%arg0: i32) -> (i32, i32) {
    %c0_i32 = arith.constant 0 : i32
    %c0_i32_0 = arith.constant 0 : i32
    %c0_i32_1 = arith.constant 0 : i32
    return %c0_i32, %c0_i32_0 : i32, i32
  }
  func.func @transform_5(%arg0: i32) -> (i32, i32) {
    %c0_i32 = arith.constant 0 : i32
    %c0_i32_0 = arith.constant 0 : i32
    %c0_i32_1 = arith.constant 0 : i32
    return %c0_i32, %c0_i32_0 : i32, i32
  }
  func.func @transform_6(%arg0: i32) -> (i32, i32) {
    %c0_i32 = arith.constant 0 : i32
    %c0_i32_0 = arith.constant 0 : i32
    %c0_i32_1 = arith.constant 0 : i32
    return %c0_i32, %c0_i32_0 : i32, i32
  }
  func.func @transform_7(%arg0: i32) -> (i32, i32) {
    %c0_i32 = arith.constant 0 : i32
    %c0_i32_0 = arith.constant 0 : i32
    return %arg0, %c0_i32 : i32, i32
  }
}

</mosaic_0001>

<bundles_post_ra>
// kernel: tpu_custom_call.1
= control target key start
LH: loop header
LB: loop body
LE: loop exit
PB: predicated region body
PF: predicated region fallthrough
CT: control target
= control target key end

     0   :  { %12 = vsyncpa [#allocation3], 0  ;;  %s833_s0 = inlined_call_operand.hbm [shape: f32[16,16], index: 0, kind: input, shape index: {}]   ;;  %s834_s1 = inlined_call_operand.hbm [shape: f32[16,16], index: 1, kind: input, shape index: {}]   ;;  %s835_s2 = inlined_call_operand.hbm [shape: f32[16,128], index: 2, kind: input, shape index: {}]   ;;  %s836_s3 = inlined_call_operand.hbm [shape: f32[16,128], index: 3, kind: input, shape index: {}]   ;;  %s837_s4 = inlined_call_operand.vmem [shape: f32[1,128], index: 4, kind: input, shape index: {}]   ;;  %s838_s5 = inlined_call_operand.hbm [shape: f32[128,128], index: 5, kind: input, shape index: {}]   ;;  %s839_s6 = inlined_call_operand.vmem [shape: f32[1,128], index: 6, kind: input, shape index: {}]   ;;  %s840_s7 = inlined_call_operand.hbm [shape: f32[16,128], index: 7, kind: output, shape index: {}]  }
   0x1   :  { %13 = vsyncpa [#allocation6], 0 }
   0x2   :  { %14 = vsyncpa [#allocation9], 0 }
   0x3   :  { %15 = vsyncpa [#allocation4], 0  ;;  %s671_s24 = smov [#allocation5]   ;;  %s672_s26 = smov [#allocation8]  }
   0x4   :  { %s33_s25 = sshll.u32 %s671_s24, 4  ;;  %s57_s27 = sshll.u32 %s672_s26, 4  ;;  %s34_s25 = int_to_ptr.vmem [resolvable:$true] %s33_s25  ;;  %s719_s27 = int_to_ptr.vmem [resolvable:$true] %s57_s27 }
   0x5   :  { %s531_s30 = scalar_lea.hbm %s834_s1, 256 }
   0x6   :  { %p532_p0 = scmp.ne.s32.totalorder %s834_s1, %s531_s30  ;;  %p535_p1 = scmp.lt.u32.totalorder %s531_s30, %s834_s1 }
   0x8   :  { %p537_p2 = pnand %p535_p1, %p532_p0 }
   0xa   :  { %540 = shalt.err (!%p537_p2)
}
   0xb   :  { %s541_s12 = scalar_lea.vmem %s34_s25, 256  ;;  %p546_p4 = scmp.lt.s32.totalorder %s34_s25, %s34_s25 }
   0xc   :  { %p542_p3 = scmp.ne.s32.totalorder %s34_s25, %s541_s12  ;;  %p547_p5 = scmp.lt.s32.totalorder %s541_s12, %s541_s12 }
   0xe   :  { %p548_p6 = por %p547_p5, %p546_p4 }
  0x10   :  { %p549_p7 = pnand %p548_p6, %p542_p3 }
  0x12   :  { %552 = shalt.err (!%p549_p7)
}
  0x13   :  { %s673_s13 = smov 128   ;;  %s674_s14 = smov 8  }
  0x14   :  { %39 = dma.hbm_to_vmem [thread:$0]  %s834_s1, 256, %s34_s25, [#allocation6], %s673_s13, %s673_s13, %s674_s14  }
  0x15   :  { %s553_s19 = scalar_lea.hbm %s836_s3, 256 }
  0x16   :  { %p554_p8 = scmp.ne.s32.totalorder %s836_s3, %s553_s19  ;;  %p557_p9 = scmp.lt.u32.totalorder %s553_s19, %s836_s3 }
  0x18   :  { %p559_p10 = pnand %p557_p9, %p554_p8 }
  0x1a   :  { %562 = shalt.err (!%p559_p10)
}
  0x1b   :  { %s563_s24 = scalar_lea.vmem %s719_s27, 256  ;;  %p568_p12 = scmp.lt.s32.totalorder %s719_s27, %s719_s27 }
  0x1c   :  { %p564_p11 = scmp.ne.s32.totalorder %s719_s27, %s563_s24  ;;  %p569_p13 = scmp.lt.s32.totalorder %s563_s24, %s563_s24 }
  0x1e   :  { %p570_p0 = por %p569_p13, %p568_p12 }
  0x20   :  { %p571_p1 = pnand %p570_p0, %p564_p11 }
  0x22   :  { %574 = shalt.err (!%p571_p1)
}
  0x23   :  { %63 = dma.hbm_to_vmem [thread:$0]  %s836_s3, 256, %s719_s27, [#allocation9], %s673_s13, %s673_s13, %s674_s14  }
  0x24   :  { %s675_s26 = smov [#allocation2]   ;;  %s676_s29 = smov [#allocation7]  }
  0x25   :  { %s21_s28 = sshll.u32 %s675_s26, 4  ;;  %s45_s30 = sshll.u32 %s676_s29, 4  ;;  %s22_s28 = int_to_ptr.vmem [resolvable:$true] %s21_s28  ;;  %s756_s30 = int_to_ptr.vmem [resolvable:$true] %s45_s30 }
  0x26   :  { %s575_s10 = scalar_lea.hbm %s833_s0, 256 }
  0x27   :  { %p576_p2 = scmp.ne.s32.totalorder %s833_s0, %s575_s10  ;;  %p579_p3 = scmp.lt.u32.totalorder %s575_s10, %s833_s0 }
  0x29   :  { %p581_p4 = pnand %p579_p3, %p576_p2 }
  0x2b   :  { %584 = shalt.err (!%p581_p4)
}
  0x2c   :  { %s585_s3 = scalar_lea.vmem %s22_s28, 256  ;;  %p590_p6 = scmp.lt.s32.totalorder %s22_s28, %s22_s28 }
  0x2d   :  { %p586_p5 = scmp.ne.s32.totalorder %s22_s28, %s585_s3  ;;  %p591_p7 = scmp.lt.s32.totalorder %s585_s3, %s585_s3 }
  0x2f   :  { %p592_p8 = por %p591_p7, %p590_p6 }
  0x31   :  { %p593_p9 = pnand %p592_p8, %p586_p5 }
  0x33   :  { %596 = shalt.err (!%p593_p9)
}
  0x34   :  { %27 = dma.hbm_to_vmem [thread:$0]  %s833_s0, 256, %s22_s28, [#allocation3], %s673_s13, %s673_s13, %s674_s14  }
  0x35   :  { %s597_s20 = scalar_lea.hbm %s835_s2, 256 }
  0x36   :  { %p598_p10 = scmp.ne.s32.totalorder %s835_s2, %s597_s20  ;;  %p601_p11 = scmp.lt.u32.totalorder %s597_s20, %s835_s2 }
  0x38   :  { %p603_p12 = pnand %p601_p11, %p598_p10 }
  0x3a   :  { %606 = shalt.err (!%p603_p12)
}
  0x3b   :  { %s607_s1 = scalar_lea.vmem %s756_s30, 256  ;;  %p612_p0 = scmp.lt.s32.totalorder %s756_s30, %s756_s30 }
  0x3c   :  { %p608_p13 = scmp.ne.s32.totalorder %s756_s30, %s607_s1  ;;  %p613_p1 = scmp.lt.s32.totalorder %s607_s1, %s607_s1 }
  0x3e   :  { %p614_p2 = por %p613_p1, %p612_p0 }
  0x40   :  { %p615_p3 = pnand %p614_p2, %p608_p13 }
  0x42   :  { %618 = shalt.err (!%p615_p3)
}
  0x43   :  { %51 = dma.hbm_to_vmem [thread:$0]  %s835_s2, 256, %s756_s30, [#allocation6], %s673_s13, %s673_s13, %s674_s14  }
  0x44   :  { %s677_s26 = smov [#allocation10]   ;;  %s619_s9 = scalar_lea.hbm %s838_s5, 2048 }
  0x45   :  { %s71_s28 = sshll.u32 %s677_s26, 4  ;;  %p620_p4 = scmp.ne.s32.totalorder %s838_s5, %s619_s9  ;;  %s72_s28 = int_to_ptr.vmem [resolvable:$true] %s71_s28 }
  0x46   :  { %p623_p5 = scmp.lt.u32.totalorder %s619_s9, %s838_s5 }
  0x48   :  { %p625_p6 = pnand %p623_p5, %p620_p4 }
  0x4a   :  { %628 = shalt.err (!%p625_p6)
}
  0x4b   :  { %s629_s16 = scalar_lea.vmem %s72_s28, 2048  ;;  %p634_p8 = scmp.lt.s32.totalorder %s72_s28, %s72_s28 }
  0x4c   :  { %p630_p7 = scmp.ne.s32.totalorder %s72_s28, %s629_s16  ;;  %p635_p9 = scmp.lt.s32.totalorder %s629_s16, %s629_s16 }
  0x4e   :  { %p636_p10 = por %p635_p9, %p634_p8 }
  0x50   :  { %p637_p11 = pnand %p636_p10, %p630_p7 }
  0x52   :  { %640 = shalt.err (!%p637_p11)
}
  0x53   :  { %77 = dma.hbm_to_vmem [thread:$0]  %s838_s5, 2048, %s72_s28, [#allocation9], %s673_s13, %s673_s13, %s674_s14  }
  0x54   :  { %663 = dma.done.wait [#allocation3], 256  }
  0x55   :  { %664 = vsyncadd [#allocation3], 4294967040 }
  0x56   :  { %665 = dma.done.wait [#allocation6], 512  }
  0x57   :  { %666 = vsyncadd [#allocation6], 4294966784 }
  0x58   :  { %667 = dma.done.wait [#allocation9], 2304  }
  0x59   :  { %668 = vsyncadd [#allocation9], 4294964992  ;;  %vm103_vm0 = vcmask 130048   ;;  %v101_v0 = vld [vmem:[#allocation8] sm:$0xff]  ;;  %v102_v1 = vld [vmem:[#allocation8 + $0x8] sm:$0xff]  ;;  %s678_s18 = smov [#allocation11]  }
  0x5a   :  { %v99_v2 = vld [vmem:[#allocation5] sm:$0xff]  ;;  %v481_v3 = vpack.c.bf16 %v102_v1, %v101_v0  ;;  %v97_v4 = vld [vmem:[#allocation7] sm:$0xff]  ;;  %v98_v5 = vld [vmem:[#allocation7 + $0x8] sm:$0xff]  ;;  %s386_s19 = sshll.u32 %s678_s18, 4  ;;  %s387_s19 = int_to_ptr.vmem [resolvable:$true] %s386_s19 }
  0x5b   :  { %436 = vmatprep.mubr.msk.f32.mxu0 %vm103_vm0, %v99_v2  ;;  %v485_v6 = vpack.c.bf16 %v98_v5, %v97_v4  ;;  %v279_v7 = vld [vmem:[#allocation10] sm:$0xff]  ;;  %v280_v8 = vld [vmem:[#allocation10 + $0x8] sm:$0xff]  ;;  %v281_v9 = vld [vmem:[#allocation10 + $0x10] sm:$0xff]  ;;  %p646_p13 = scmp.lt.s32.totalorder %s387_s19, %s387_s19 }
  0x5c   :  { %482 = vmatprep.subr.bf16.mxu0 %v481_v3  ;;  %v282_v10 = vld [vmem:[#allocation10 + $0x18] sm:$0xff]  ;;  %v489_v12 = vpack.c.bf16 %v280_v8, %v279_v7  ;;  %v95_v13 = vld [vmem:[#allocation2] sm:$0xff]  ;;  %v284_v16 = vld [vmem:[#allocation10 + $0x28] sm:$0xff] }
  0x5d   :  { %484 = vmatpush3.bf16.msra.mxu0 %v481_v3  ;;  %v100_v11 = vld [vmem:[#allocation5 + $0x8] sm:$0xff]  ;;  %v493_v14 = vpack.c.bf16 %v282_v10, %v281_v9  ;;  %v283_v15 = vld [vmem:[#allocation10 + $0x20] sm:$0xff]  ;;  %v285_v18 = vld [vmem:[#allocation10 + $0x30] sm:$0xff] }
  0x5e   :  { %486 = vmatprep.subr.bf16.mxu0 %v485_v6  ;;  %490 = vmatprep.subr.bf16.mxu1 %v489_v12  ;;  %v497_v17 = vpack.c.bf16 %v284_v16, %v283_v15  ;;  %v286_v19 = vld [vmem:[#allocation10 + $0x38] sm:$0xff]  ;;  %v96_v20 = vld [vmem:[#allocation2 + $0x8] sm:$0xff]  ;;  %v287_v22 = vld [vmem:[#allocation10 + $0x40] sm:$0xff] }
  0x5f   :  { %492 = vmatpush3.bf16.msra.mxu1 %v489_v12  ;;  %v501_v21 = vpack.c.bf16 %v286_v19, %v285_v18  ;;  %v288_v23 = vld [vmem:[#allocation10 + $0x48] sm:$0xff]  ;;  %v289_v25 = vld [vmem:[#allocation10 + $0x50] sm:$0xff]  ;;  %v290_v26 = vld [vmem:[#allocation10 + $0x58] sm:$0xff] }
  0x60   :  { %437 = vmatmul.mubr.msk.f32.vlgmr.msra.gmra.mrb[0].mxu0 %vm103_vm0, %v100_v11  ;;  %494 = vmatprep.subr.bf16.mxu1 %v493_v14  ;;  %v505_v24 = vpack.c.bf16 %v288_v23, %v287_v22  ;;  %v509_v27 = vpack.c.bf16 %v290_v26, %v289_v25  ;;  %v291_v28 = vld [vmem:[#allocation10 + $0x60] sm:$0xff]  ;;  %v292_v29 = vld [vmem:[#allocation10 + $0x68] sm:$0xff]  ;;  %v293_v31 = vld [vmem:[#allocation10 + $0x70] sm:$0xff] }
  0x61   :  { %488 = vmatpush3.bf16.msra.mxu0 %v485_v6  ;;  %443 = vmatprep.mubr.msk.f32.mxu0 %vm103_vm0, %v95_v13  ;;  %v513_v30 = vpack.c.bf16 %v292_v29, %v291_v28  ;;  %v294_v32 = vld [vmem:[#allocation10 + $0x78] sm:$0xff]  ;;  %v404_v34 = vld [vmem:[%s837_s4] ss:$0 sm:$0xff]  ;;  %s641_s4 = scalar_lea.vmem %s387_s19, 256 }
  0x62   :  { %v517_v33 = vpack.c.bf16 %v294_v32, %v293_v31  ;;  %v405_v43 = vld [vmem:[%s839_s6] ss:$0 sm:$0xff]  ;;  %p642_p12 = scmp.ne.s32.totalorder %s387_s19, %s641_s4  ;;  %p647_p0 = scmp.lt.s32.totalorder %s641_s4, %s641_s4 }
  0x63   :  { %496 = vmatpush3.bf16.msra.mxu1 %v493_v14 }
  0x64   :  { %498 = vmatprep.subr.bf16.mxu1 %v497_v17  ;;  %p648_p1 = por %p647_p0, %p646_p13 }
  0x66   :  { %p649_p2 = pnand %p648_p1, %p642_p12 }
  0x67   :  { %500 = vmatpush3.bf16.msra.mxu1 %v497_v17 }
  0x68   :  { %444 = vmatmul.mubr.msk.f32.vlgmr.msra.gmra.mrb[0].mxu0 %vm103_vm0, %v96_v20  ;;  %502 = vmatprep.subr.bf16.mxu1 %v501_v21 }
  0x6b   :  { %504 = vmatpush3.bf16.msra.mxu1 %v501_v21 }
  0x6c   :  { %506 = vmatprep.subr.bf16.mxu1 %v505_v24 }
  0x6f   :  { %508 = vmatpush3.bf16.msra.mxu1 %v505_v24 }
  0x70   :  { %510 = vmatprep.subr.bf16.mxu1 %v509_v27 }
  0x73   :  { %512 = vmatpush3.bf16.msra.mxu1 %v509_v27 }
  0x74   :  { %514 = vmatprep.subr.bf16.mxu1 %v513_v30 }
  0x77   :  { %516 = vmatpush3.bf16.msra.mxu1 %v513_v30 }
  0x78   :  { %518 = vmatprep.subr.bf16.mxu1 %v517_v33 }
  0x7b   :  { %520 = vmatpush3.bf16.msra.mxu1 %v517_v33 }
 0x13b   :  { %v445_v35 = vpop.f32.mrb[0].mxu0 }
 0x13c   :  { %v274_v36 = vadd.f32 %v445_v35, %v404_v34  ;;  %v257_v37 = vpop.f32.mrb[1].mxu0 }
 0x13d   :  { %v273_v38 = vadd.f32 %v404_v34, %v257_v37 }
 0x13e   :  { %v276_v39 = vmul.f32 0.2, %v274_v36 }
 0x13f   :  { %v275_v40 = vmul.f32 0.2, %v273_v38 }
 0x140   :  { %v278_v42 = vmax.f32 %v274_v36, %v276_v39 }
 0x141   :  { %v277_v41 = vmax.f32 %v273_v38, %v275_v40 }
 0x143   :  { %478 = vmatprep.mubr.f32.mxu1 %v277_v41 }
 0x144   :  { %479 = vmatmul.mubr.f32.vlgmr.msra.gmra.mrb[0].mxu1 %v278_v42 }
 0x217   :  { %v480_v44 = vpop.f32.mrb[0].mxu1 }
 0x218   :  { %v374_v45 = vadd.f32 %v480_v44, %v405_v43  ;;  %v368_v46 = vpop.f32.mrb[1].mxu1 }
 0x219   :  { %v369_v47 = vadd.f32 %v405_v43, %v368_v46 }
 0x21a   :  { %v378_v48 = vmax.f32 %v374_v45, 0.0 }
 0x21b   :  { %v377_v49 = vmax.f32 %v369_v47, 0.0 }
 0x21c   :  { %380 = vst [vmem:[#allocation11 + $0x8] sm:$0xff] %v378_v48 }
 0x21d   :  { %379 = vst [vmem:[#allocation11] sm:$0xff] %v377_v49 }
 0x21e   :  { %652 = shalt.err (!%p649_p2)
}
 0x21f   :  { %s653_s21 = scalar_lea.hbm %s840_s7, 256 }
 0x220   :  { %p654_p3 = scmp.ne.s32.totalorder %s840_s7, %s653_s21  ;;  %p657_p4 = scmp.lt.u32.totalorder %s653_s21, %s840_s7 }
 0x222   :  { %p659_p5 = pnand %p657_p4, %p654_p3 }
 0x224   :  { %662 = shalt.err (!%p659_p5)
}
 0x225   :  { %392 = dma.vmem_to_hbm [thread:$0]  %s387_s19, 256, %s840_s7, [#allocation4], %s673_s13, %s673_s13, %s674_s14  }
 0x226   :  { %669 = dma.done.wait [#allocation4], 256  }
 0x227   :  { %670 = vsyncadd [#allocation4], 4294967040 }
 0x228   :  { %396 = vsyncpa [#allocation3], 1 }
 0x229   :  { %397 = vsyncpa [#allocation6], 1 }
 0x22a   :  { %398 = vsyncpa [#allocation9], 1 }
 0x22b   :  { %399 = vsyncpa [#allocation4], 1 }

</bundles_post_ra>
